<compile_context>
chip_gen: v6e
topology: v6e:2x2x1
jax: 0.10.0
libtpu: 0.0.40
codegen_flags: <defaults>
</compile_context>

<pallas_src>
import functools
from typing import NamedTuple, Tuple

import jax
import jax.numpy as jnp
from jax.experimental import pallas as pl
from jax.experimental.pallas import tpu as pltpu


def _round_up(n: int, m: int) -> int:
    return ((n + m - 1) // m) * m


def _mlp_kernel(num_matmuls, compute_dtype, *refs):
    """refs = (x_ref, w0_ref, b0_ref, ..., w_{L-1}_ref, b_{L-1}_ref, o_ref).

    x_ref:  (tile_b, in_pad)   compute_dtype (bf16)
    w_ref:  (in_pad, out_pad)  compute_dtype (bf16), pre-transposed
    b_ref:  (1, out_pad)       f32
    o_ref:  (tile_b, out_pad)  f32
    """
    x_ref = refs[0]
    o_ref = refs[-1]
    wb_refs = refs[1:-1]

    h = x_ref[...]  # bf16 operand straight into the MXU
    for li in range(num_matmuls):
        w = wb_refs[2 * li][...]        # (in_pad, out_pad) bf16
        b = wb_refs[2 * li + 1][...]    # (1, out_pad) f32
        acc = jnp.dot(h, w, preferred_element_type=jnp.float32) + b  # f32 epilogue
        # ReLU only follows the hidden->hidden Linears (not the first, not the last).
        if 1 <= li < num_matmuls - 1:
            acc = jnp.maximum(acc, 0.0)
        if li < num_matmuls - 1:
            h = acc.astype(compute_dtype)
        else:
            o_ref[...] = acc.astype(o_ref.dtype)


class PreparedMLP(NamedTuple):
    # ((Wt_pad, b_pad), ...): Wt_pad (in_pad, out_pad) compute_dtype, b_pad (1, out_pad) f32
    weights: Tuple
    in_features: int
    out_features: int
    compute_dtype: object


def prepare_mlp_params(params, compute_dtype=jnp.bfloat16) -> PreparedMLP:
    """One-time transform: PyTorch (out,in) W -> padded, transposed, bf16 (in_pad,out_pad).

    Zero-padding the extra rows/cols (and bias entries) keeps padded channels
    exactly 0 through every layer, so no semantics change.
    """
    prepared = []
    for (W, b) in params:
        W = jnp.asarray(W, jnp.float32)
        b = jnp.asarray(b, jnp.float32)
        out_f, in_f = W.shape
        in_p, out_p = _round_up(in_f, 128), _round_up(out_f, 128)
        Wt = jnp.zeros((in_p, out_p), compute_dtype).at[:in_f, :out_f].set(
            W.T.astype(compute_dtype))
        b2 = jnp.zeros((1, out_p), jnp.float32).at[:, :out_f].set(b[None, :])
        prepared.append((Wt, b2))
    return PreparedMLP(tuple(prepared),
                       in_features=params[0][0].shape[1],
                       out_features=params[-1][0].shape[0],
                       compute_dtype=compute_dtype)


def mlp_pallas(x, prepared: PreparedMLP, *, tile_b=None):
    """x: (B, input_size) f32; prepared: output of prepare_mlp_params (cache & reuse)."""
    B, in_f = x.shape
    assert in_f == prepared.in_features, "input feature size mismatch"
    compute_dtype = prepared.compute_dtype
    wbs = prepared.weights
    num_matmuls = len(wbs)
    in_p = wbs[0][0].shape[0]
    out_p = wbs[-1][0].shape[1]

    # Batch tile: multiple of 16 (bf16 sublane packing), as large as reasonable.
    # Cap keeps per-step VMEM tiny even with double-buffered tiles; for huge
    # hidden sizes on v7x (64 MiB VMEM) lower the cap or tile the N dimension.
    if tile_b is None:
        tile_b = min(512, _round_up(B, 16))
    tile_b = _round_up(tile_b, 16)
    B_pad = _round_up(B, tile_b)

    # Pad + cast activations once (zero rows / cols contribute nothing).
    xp = jnp.zeros((B_pad, in_p), compute_dtype).at[:B, :in_f].set(
        x.astype(compute_dtype))

    flat_inputs = [xp]
    in_specs = [pl.BlockSpec((tile_b, in_p), lambda i: (i, 0))]
    for (Wt, b2) in wbs:
        flat_inputs += [Wt, b2]
        in_specs += [
            pl.BlockSpec(Wt.shape, lambda i: (0, 0)),  # whole layer resident in VMEM
            pl.BlockSpec(b2.shape, lambda i: (0, 0)),
        ]

    kernel = functools.partial(_mlp_kernel, num_matmuls, compute_dtype)
    out_padded = pl.pallas_call(
        kernel,
        out_shape=jax.ShapeDtypeStruct((B_pad, out_p), x.dtype),
        grid=(B_pad // tile_b,),
        in_specs=in_specs,
        out_specs=pl.BlockSpec((tile_b, out_p), lambda i: (i, 0)),
        compiler_params=pltpu.CompilerParams(
            dimension_semantics=("parallel",)),  # batch steps shard across v7x's 2 TCs
    )(*flat_inputs)

    # Strip batch padding and the padded (all-zero) output channels.
    return out_padded[:B, :prepared.out_features]


def init_mlp_params(key, input_size, hidden_size, num_hidden_layers, output_size):
    """Deterministic PyTorch-like (uniform +/- 1/sqrt(fan_in)) initialization."""
    dims = [(input_size, hidden_size)]
    dims += [(hidden_size, hidden_size)] * (num_hidden_layers - 1)
    dims += [(hidden_size, output_size)]
    params = []
    for (fan_in, fan_out) in dims:
        key, kw, kb = jax.random.split(key, 3)
        bound = 1.0 / jnp.sqrt(jnp.float32(fan_in))
        W = jax.random.uniform(kw, (fan_out, fan_in), jnp.float32, -bound, bound)
        b = jax.random.uniform(kb, (fan_out,), jnp.float32, -bound, bound)
        params.append((W, b))
    return params


def mlp_reference(x, params, compute_dtype=jnp.bfloat16):
    """Pure-JAX reference matching the PyTorch Sequential, with the same
    bf16-operand / f32-accumulate matmul precision as the kernel."""
    num_matmuls = len(params)
    h = x
    for li, (W, b) in enumerate(params):
        h = jnp.dot(h.astype(compute_dtype), W.T.astype(compute_dtype),
                    preferred_element_type=jnp.float32) + b
        if 1 <= li < num_matmuls - 1:
            h = jnp.maximum(h, 0.0)
    return h


if __name__ == "__main__":
    input_size, hidden_size, num_hidden_layers, output_size = 16, 32, 3, 4
    batch = 8

    key = jax.random.PRNGKey(0)
    key, kx = jax.random.split(key)
    x = jax.random.normal(kx, (batch, input_size), dtype=jnp.float32)
    params = init_mlp_params(key, input_size, hidden_size, num_hidden_layers, output_size)

    prepared = prepare_mlp_params(params)   # transpose / pad / bf16-cast ONCE, reuse per call
    out = mlp_pallas(x, prepared)
    out = jax.block_until_ready(out)

    ref = mlp_reference(x, params)
    assert out.shape == (batch, output_size)
    assert jnp.allclose(out, ref, atol=1e-3, rtol=1e-3), "mismatch vs reference"

    print("KERNEL_OK")
</pallas_src>

<mosaic_0001>
module attributes {stable_mosaic.version = 11 : i64} {
  func.func @_mlp_kernel(%arg0: i32, %arg1: memref<16x128xbf16, #tpu.memory_space<vmem>>, %arg2: memref<128x128xbf16, #tpu.memory_space<vmem>>, %arg3: memref<1x128xf32, #tpu.memory_space<vmem>>, %arg4: memref<128x128xbf16, #tpu.memory_space<vmem>>, %arg5: memref<1x128xf32, #tpu.memory_space<vmem>>, %arg6: memref<128x128xbf16, #tpu.memory_space<vmem>>, %arg7: memref<1x128xf32, #tpu.memory_space<vmem>>, %arg8: memref<128x128xbf16, #tpu.memory_space<vmem>>, %arg9: memref<1x128xf32, #tpu.memory_space<vmem>>, %arg10: memref<16x128xf32, #tpu.memory_space<vmem>>) attributes {dimension_semantics = [#tpu.dimension_semantics<parallel>], iteration_bounds = array<i64: 1>, scalar_prefetch = 0 : i64, scratch_operands = 0 : i64, tpu.core_type = #tpu.core_type<tc>, window_params = [{transform_indices = @transform_0, window_bounds = array<i64: 16, 128>}, {pipeline_mode = #tpu.pipeline_mode<synchronous>, transform_indices = @transform_1, window_bounds = array<i64: 128, 128>}, {pipeline_mode = #tpu.pipeline_mode<synchronous>, transform_indices = @transform_2, window_bounds = array<i64: 1, 128>}, {pipeline_mode = #tpu.pipeline_mode<synchronous>, transform_indices = @transform_3, window_bounds = array<i64: 128, 128>}, {pipeline_mode = #tpu.pipeline_mode<synchronous>, transform_indices = @transform_4, window_bounds = array<i64: 1, 128>}, {pipeline_mode = #tpu.pipeline_mode<synchronous>, transform_indices = @transform_5, window_bounds = array<i64: 128, 128>}, {pipeline_mode = #tpu.pipeline_mode<synchronous>, transform_indices = @transform_6, window_bounds = array<i64: 1, 128>}, {pipeline_mode = #tpu.pipeline_mode<synchronous>, transform_indices = @transform_7, window_bounds = array<i64: 128, 128>}, {pipeline_mode = #tpu.pipeline_mode<synchronous>, transform_indices = @transform_8, window_bounds = array<i64: 1, 128>}, {transform_indices = @transform_9, window_bounds = array<i64: 16, 128>}]} {
    %c0 = arith.constant 0 : index
    %c0_0 = arith.constant 0 : index
    %0 = vector.load %arg1[%c0, %c0_0] : memref<16x128xbf16, #tpu.memory_space<vmem>>, vector<16x128xbf16>
    %c0_1 = arith.constant 0 : index
    %c0_2 = arith.constant 0 : index
    %1 = vector.load %arg2[%c0_1, %c0_2] : memref<128x128xbf16, #tpu.memory_space<vmem>>, vector<128x128xbf16>
    %c0_3 = arith.constant 0 : index
    %c0_4 = arith.constant 0 : index
    %2 = vector.load %arg3[%c0_3, %c0_4] : memref<1x128xf32, #tpu.memory_space<vmem>>, vector<1x128xf32>
    %cst = arith.constant dense<0.000000e+00> : vector<16x128xf32>
    %3 = tpu.matmul %0, %1, %cst {dimension_numbers = #tpu.dot_dimension_numbers<[1], [0], [0], [1], [0, 0, 1, 1], [], []>} : vector<16x128xbf16>, vector<128x128xbf16>, vector<16x128xf32> -> vector<16x128xf32>
    %4 = vector.broadcast %2 : vector<1x128xf32> to vector<16x128xf32>
    %5 = arith.addf %3, %4 : vector<16x128xf32>
    %6 = arith.truncf %5 : vector<16x128xf32> to vector<16x128xbf16>
    %c0_5 = arith.constant 0 : index
    %c0_6 = arith.constant 0 : index
    %7 = vector.load %arg4[%c0_5, %c0_6] : memref<128x128xbf16, #tpu.memory_space<vmem>>, vector<128x128xbf16>
    %c0_7 = arith.constant 0 : index
    %c0_8 = arith.constant 0 : index
    %8 = vector.load %arg5[%c0_7, %c0_8] : memref<1x128xf32, #tpu.memory_space<vmem>>, vector<1x128xf32>
    %cst_9 = arith.constant dense<0.000000e+00> : vector<16x128xf32>
    %9 = tpu.matmul %6, %7, %cst_9 {dimension_numbers = #tpu.dot_dimension_numbers<[1], [0], [0], [1], [0, 0, 1, 1], [], []>} : vector<16x128xbf16>, vector<128x128xbf16>, vector<16x128xf32> -> vector<16x128xf32>
    %10 = vector.broadcast %8 : vector<1x128xf32> to vector<16x128xf32>
    %11 = arith.addf %9, %10 : vector<16x128xf32>
    %cst_10 = arith.constant 0.000000e+00 : f32
    %12 = vector.broadcast %cst_10 : f32 to vector<16x128xf32>
    %13 = arith.maximumf %11, %12 : vector<16x128xf32>
    %14 = arith.truncf %13 : vector<16x128xf32> to vector<16x128xbf16>
    %c0_11 = arith.constant 0 : index
    %c0_12 = arith.constant 0 : index
    %15 = vector.load %arg6[%c0_11, %c0_12] : memref<128x128xbf16, #tpu.memory_space<vmem>>, vector<128x128xbf16>
    %c0_13 = arith.constant 0 : index
    %c0_14 = arith.constant 0 : index
    %16 = vector.load %arg7[%c0_13, %c0_14] : memref<1x128xf32, #tpu.memory_space<vmem>>, vector<1x128xf32>
    %cst_15 = arith.constant dense<0.000000e+00> : vector<16x128xf32>
    %17 = tpu.matmul %14, %15, %cst_15 {dimension_numbers = #tpu.dot_dimension_numbers<[1], [0], [0], [1], [0, 0, 1, 1], [], []>} : vector<16x128xbf16>, vector<128x128xbf16>, vector<16x128xf32> -> vector<16x128xf32>
    %18 = vector.broadcast %16 : vector<1x128xf32> to vector<16x128xf32>
    %19 = arith.addf %17, %18 : vector<16x128xf32>
    %cst_16 = arith.constant 0.000000e+00 : f32
    %20 = vector.broadcast %cst_16 : f32 to vector<16x128xf32>
    %21 = arith.maximumf %19, %20 : vector<16x128xf32>
    %22 = arith.truncf %21 : vector<16x128xf32> to vector<16x128xbf16>
    %c0_17 = arith.constant 0 : index
    %c0_18 = arith.constant 0 : index
    %23 = vector.load %arg8[%c0_17, %c0_18] : memref<128x128xbf16, #tpu.memory_space<vmem>>, vector<128x128xbf16>
    %c0_19 = arith.constant 0 : index
    %c0_20 = arith.constant 0 : index
    %24 = vector.load %arg9[%c0_19, %c0_20] : memref<1x128xf32, #tpu.memory_space<vmem>>, vector<1x128xf32>
    %cst_21 = arith.constant dense<0.000000e+00> : vector<16x128xf32>
    %25 = tpu.matmul %22, %23, %cst_21 {dimension_numbers = #tpu.dot_dimension_numbers<[1], [0], [0], [1], [0, 0, 1, 1], [], []>} : vector<16x128xbf16>, vector<128x128xbf16>, vector<16x128xf32> -> vector<16x128xf32>
    %26 = vector.broadcast %24 : vector<1x128xf32> to vector<16x128xf32>
    %27 = arith.addf %25, %26 : vector<16x128xf32>
    %c0_22 = arith.constant 0 : index
    %c0_23 = arith.constant 0 : index
    %28 = vector.load %arg10[%c0_22, %c0_23] : memref<16x128xf32, #tpu.memory_space<vmem>>, vector<16x128xf32>
    tpu.vector_store %arg10[%c0_22, %c0_23], %27 {strides = array<i32>} : memref<16x128xf32, #tpu.memory_space<vmem>>, vector<16x128xf32>,
    return
  }
  func.func @transform_0(%arg0: i32) -> (i32, i32) {
    %c0_i32 = arith.constant 0 : i32
    %c0_i32_0 = arith.constant 0 : i32
    return %arg0, %c0_i32 : i32, i32
  }
  func.func @transform_1(%arg0: i32) -> (i32, i32) {
    %c0_i32 = arith.constant 0 : i32
    %c0_i32_0 = arith.constant 0 : i32
    %c0_i32_1 = arith.constant 0 : i32
    return %c0_i32, %c0_i32_0 : i32, i32
  }
  func.func @transform_2(%arg0: i32) -> (i32, i32) {
    %c0_i32 = arith.constant 0 : i32
    %c0_i32_0 = arith.constant 0 : i32
    %c0_i32_1 = arith.constant 0 : i32
    return %c0_i32, %c0_i32_0 : i32, i32
  }
  func.func @transform_3(%arg0: i32) -> (i32, i32) {
    %c0_i32 = arith.constant 0 : i32
    %c0_i32_0 = arith.constant 0 : i32
    %c0_i32_1 = arith.constant 0 : i32
    return %c0_i32, %c0_i32_0 : i32, i32
  }
  func.func @transform_4(%arg0: i32) -> (i32, i32) {
    %c0_i32 = arith.constant 0 : i32
    %c0_i32_0 = arith.constant 0 : i32
    %c0_i32_1 = arith.constant 0 : i32
    return %c0_i32, %c0_i32_0 : i32, i32
  }
  func.func @transform_5(%arg0: i32) -> (i32, i32) {
    %c0_i32 = arith.constant 0 : i32
    %c0_i32_0 = arith.constant 0 : i32
    %c0_i32_1 = arith.constant 0 : i32
    return %c0_i32, %c0_i32_0 : i32, i32
  }
  func.func @transform_6(%arg0: i32) -> (i32, i32) {
    %c0_i32 = arith.constant 0 : i32
    %c0_i32_0 = arith.constant 0 : i32
    %c0_i32_1 = arith.constant 0 : i32
    return %c0_i32, %c0_i32_0 : i32, i32
  }
  func.func @transform_7(%arg0: i32) -> (i32, i32) {
    %c0_i32 = arith.constant 0 : i32
    %c0_i32_0 = arith.constant 0 : i32
    %c0_i32_1 = arith.constant 0 : i32
    return %c0_i32, %c0_i32_0 : i32, i32
  }
  func.func @transform_8(%arg0: i32) -> (i32, i32) {
    %c0_i32 = arith.constant 0 : i32
    %c0_i32_0 = arith.constant 0 : i32
    %c0_i32_1 = arith.constant 0 : i32
    return %c0_i32, %c0_i32_0 : i32, i32
  }
  func.func @transform_9(%arg0: i32) -> (i32, i32) {
    %c0_i32 = arith.constant 0 : i32
    %c0_i32_0 = arith.constant 0 : i32
    return %arg0, %c0_i32 : i32, i32
  }
}

</mosaic_0001>

<bundles_post_ra>
// kernel: tpu_custom_call.1
= control target key start
LH: loop header
LB: loop body
LE: loop exit
PB: predicated region body
PF: predicated region fallthrough
CT: control target
= control target key end

     0   :  { %14 = vsyncpa [#allocation3], 0  ;;  %s1059_s0 = inlined_call_operand.hbm [shape: bf16[16,128], index: 0, kind: input, shape index: {}]   ;;  %s1060_s1 = inlined_call_operand.hbm [shape: bf16[128,128], index: 1, kind: input, shape index: {}]   ;;  %s1061_s2 = inlined_call_operand.vmem [shape: f32[1,128], index: 2, kind: input, shape index: {}]   ;;  %s1062_s3 = inlined_call_operand.hbm [shape: bf16[128,128], index: 3, kind: input, shape index: {}]   ;;  %s1063_s4 = inlined_call_operand.vmem [shape: f32[1,128], index: 4, kind: input, shape index: {}]   ;;  %s1064_s5 = inlined_call_operand.hbm [shape: bf16[128,128], index: 5, kind: input, shape index: {}]   ;;  %s1065_s6 = inlined_call_operand.vmem [shape: f32[1,128], index: 6, kind: input, shape index: {}]   ;;  %s1066_s7 = inlined_call_operand.hbm [shape: bf16[128,128], index: 7, kind: input, shape index: {}]   ;;  %s1067_s8 = inlined_call_operand.vmem [shape: f32[1,128], index: 8, kind: input, shape index: {}]   ;;  %s1068_s9 = inlined_call_operand.hbm [shape: f32[16,128], index: 9, kind: output, shape index: {}]  }
   0x1   :  { %15 = vsyncpa [#allocation6], 0 }
   0x2   :  { %16 = vsyncpa [#allocation9], 0 }
   0x3   :  { %17 = vsyncpa [#allocation4], 0  ;;  %s912_s30 = smov [#allocation5]   ;;  %s913_s11 = smov [#allocation8]  }
   0x4   :  { %s35_s10 = sshll.u32 %s912_s30, 4  ;;  %s63_s12 = sshll.u32 %s913_s11, 4  ;;  %s36_s10 = int_to_ptr.vmem [resolvable:$true] %s35_s10  ;;  %s64_s12 = int_to_ptr.vmem [resolvable:$true] %s63_s12 }
   0x5   :  { %s792_s13 = scalar_lea.vmem %s36_s10, 1024  ;;  %p797_p1 = scmp.lt.s32.totalorder %s36_s10, %s36_s10 }
   0x6   :  { %p793_p0 = scmp.ne.s32.totalorder %s36_s10, %s792_s13  ;;  %p798_p2 = scmp.lt.s32.totalorder %s792_s13, %s792_s13 }
   0x8   :  { %p799_p3 = por %p798_p2, %p797_p1 }
   0xa   :  { %p800_p4 = pnand %p799_p3, %p793_p0 }
   0xc   :  { %803 = shalt.err (!%p800_p4)
}
   0xd   :  { %s914_s14 = smov 64   ;;  %s915_s15 = smov 4  }
   0xe   :  { %41 = dma.hbm_to_vmem [thread:$0]  %s1060_s1, 1024, %s36_s10, [#allocation6], %s914_s14, %s914_s14, %s915_s15  }
   0xf   :  { %s812_s18 = scalar_lea.vmem %s64_s12, 1024  ;;  %p817_p6 = scmp.lt.s32.totalorder %s64_s12, %s64_s12 }
  0x10   :  { %p813_p5 = scmp.ne.s32.totalorder %s64_s12, %s812_s18  ;;  %p818_p7 = scmp.lt.s32.totalorder %s812_s18, %s812_s18 }
  0x12   :  { %p819_p8 = por %p818_p7, %p817_p6 }
  0x14   :  { %p820_p9 = pnand %p819_p8, %p813_p5 }
  0x16   :  { %823 = shalt.err (!%p820_p9)
}
  0x17   :  { %69 = dma.hbm_to_vmem [thread:$0]  %s1064_s5, 1024, %s64_s12, [#allocation9], %s914_s14, %s914_s14, %s915_s15  }
  0x18   :  { %s916_s21 = smov [#allocation2]   ;;  %s917_s23 = smov [#allocation7]  }
  0x19   :  { %s23_s22 = sshll.u32 %s916_s21, 4  ;;  %s49_s24 = sshll.u32 %s917_s23, 4  ;;  %s24_s22 = int_to_ptr.vmem [resolvable:$true] %s23_s22  ;;  %s50_s24 = int_to_ptr.vmem [resolvable:$true] %s49_s24 }
  0x1a   :  { %s832_s1 = scalar_lea.vmem %s24_s22, 128  ;;  %p837_p11 = scmp.lt.s32.totalorder %s24_s22, %s24_s22 }
  0x1b   :  { %p833_p10 = scmp.ne.s32.totalorder %s24_s22, %s832_s1  ;;  %p838_p12 = scmp.lt.s32.totalorder %s832_s1, %s832_s1 }
  0x1d   :  { %p839_p13 = por %p838_p12, %p837_p11 }
  0x1f   :  { %p840_p0 = pnand %p839_p13, %p833_p10 }
  0x21   :  { %843 = shalt.err (!%p840_p0)
}
  0x22   :  { %29 = dma.hbm_to_vmem [thread:$0]  %s1059_s0, 128, %s24_s22, [#allocation3], %s914_s14, %s914_s14, %s915_s15  }
  0x23   :  { %s852_s5 = scalar_lea.vmem %s50_s24, 1024  ;;  %p857_p2 = scmp.lt.s32.totalorder %s50_s24, %s50_s24 }
  0x24   :  { %p853_p1 = scmp.ne.s32.totalorder %s50_s24, %s852_s5  ;;  %p858_p3 = scmp.lt.s32.totalorder %s852_s5, %s852_s5 }
  0x26   :  { %p859_p4 = por %p858_p3, %p857_p2 }
  0x28   :  { %p860_p5 = pnand %p859_p4, %p853_p1 }
  0x2a   :  { %863 = shalt.err (!%p860_p5)
}
  0x2b   :  { %55 = dma.hbm_to_vmem [thread:$0]  %s1062_s3, 1024, %s50_s24, [#allocation6], %s914_s14, %s914_s14, %s915_s15  }
  0x2c   :  { %s918_s29 = smov [#allocation10]  }
  0x2d   :  { %s77_s30 = sshll.u32 %s918_s29, 4  ;;  %s78_s30 = int_to_ptr.vmem [resolvable:$true] %s77_s30 }
  0x2e   :  { %s872_s10 = scalar_lea.vmem %s78_s30, 1024  ;;  %p877_p7 = scmp.lt.s32.totalorder %s78_s30, %s78_s30 }
  0x2f   :  { %p873_p6 = scmp.ne.s32.totalorder %s78_s30, %s872_s10  ;;  %p878_p8 = scmp.lt.s32.totalorder %s872_s10, %s872_s10 }
  0x31   :  { %p879_p9 = por %p878_p8, %p877_p7 }
  0x33   :  { %p880_p10 = pnand %p879_p9, %p873_p6 }
  0x35   :  { %883 = shalt.err (!%p880_p10)
}
  0x36   :  { %83 = dma.hbm_to_vmem [thread:$0]  %s1066_s7, 1024, %s78_s30, [#allocation9], %s914_s14, %s914_s14, %s915_s15  }
  0x37   :  { %904 = dma.done.wait [#allocation3], 128  }
  0x38   :  { %905 = vsyncadd [#allocation3], 4294967168 }
  0x39   :  { %906 = dma.done.wait [#allocation6], 2048  }
  0x3a   :  { %907 = vsyncadd [#allocation6], 4294965248 }
  0x3b   :  { %908 = dma.done.wait [#allocation9], 2048  }
  0x3c   :  { %909 = vsyncadd [#allocation9], 4294965248  ;;  %v919_v0 = vmov 0.0   ;;  %vm920_vm0 = vmmov 0   ;;  %v751_v1 = vld [vmem:[#allocation5 + $0x38] sm:$0xff]   ;;  %v752_v2 = vld [vmem:[#allocation5 + $0x30] sm:$0xff]  }
  0x3d   :  { %659 = vmatprep.subr.bf16.mxu0 %v919_v0  ;;  %675 = vmatprep.mubr.msk.bf16.mxu0 %vm920_vm0, %v919_v0  ;;  %v753_v3 = vld [vmem:[#allocation5 + $0x28] sm:$0xff]   ;;  %v760_v4 = vld [vmem:[#allocation7 + $0x38] sm:$0xff]   ;;  %v754_v5 = vld [vmem:[#allocation5 + $0x20] sm:$0xff]   ;;  %s921_s16 = smov [#allocation11]  }
  0x3e   :  { %679 = vmatprep.subr.bf16.mxu1 %v919_v0  ;;  %695 = vmatprep.mubr.msk.bf16.mxu1 %vm920_vm0, %v919_v0  ;;  %v761_v6 = vld [vmem:[#allocation7 + $0x30] sm:$0xff]   ;;  %v755_v7 = vld [vmem:[#allocation5 + $0x18] sm:$0xff]   ;;  %v762_v8 = vld [vmem:[#allocation7 + $0x28] sm:$0xff]   ;;  %s572_s17 = sshll.u32 %s921_s16, 4  ;;  %s573_s17 = int_to_ptr.vmem [resolvable:$true] %s572_s17 }
  0x3f   :  { %660 = vmatpush3.bf16.msra.mxu0 %v751_v1  ;;  %680 = vmatpush3.bf16.msra.mxu1 %v760_v4  ;;  %v756_v9 = vld [vmem:[#allocation5 + $0x10] sm:$0xff]   ;;  %v763_v10 = vld [vmem:[#allocation7 + $0x20] sm:$0xff]   ;;  %v757_v11 = vld [vmem:[#allocation5 + $0x8] sm:$0xff]   ;;  %p889_p12 = scmp.lt.s32.totalorder %s573_s17, %s573_s17 }
  0x40   :  { %661 = vmatprep.subr.bf16.mxu0 %v919_v0  ;;  %681 = vmatprep.subr.bf16.mxu1 %v919_v0  ;;  %v764_v12 = vld [vmem:[#allocation7 + $0x18] sm:$0xff]   ;;  %v758_v13 = vld [vmem:[#allocation5] sm:$0xff]   ;;  %v765_v14 = vld [vmem:[#allocation7 + $0x10] sm:$0xff]  }
  0x41   :  { %v759_v15 = vld [vmem:[#allocation2] sm:$0xff]   ;;  %v766_v16 = vld [vmem:[#allocation7 + $0x8] sm:$0xff]   ;;  %v767_v17 = vld [vmem:[#allocation7] sm:$0xff]  }
  0x42   :  { %v768_v18 = vld [vmem:[#allocation8 + $0x38] sm:$0xff]   ;;  %v769_v19 = vld [vmem:[#allocation8 + $0x30] sm:$0xff]   ;;  %v770_v20 = vld [vmem:[#allocation8 + $0x28] sm:$0xff]  }
  0x43   :  { %662 = vmatpush3.bf16.msra.mxu0 %v752_v2  ;;  %682 = vmatpush3.bf16.msra.mxu1 %v761_v6  ;;  %v771_v21 = vld [vmem:[#allocation8 + $0x20] sm:$0xff]   ;;  %v772_v22 = vld [vmem:[#allocation8 + $0x18] sm:$0xff]   ;;  %v773_v31 = vld [vmem:[#allocation8 + $0x10] sm:$0xff]  }
  0x44   :  { %663 = vmatprep.subr.bf16.mxu0 %v919_v0  ;;  %683 = vmatprep.subr.bf16.mxu1 %v919_v0  ;;  %v586_v24 = vld [vmem:[%s1061_s2] ss:$0 sm:$0xff]  ;;  %v774_v32 = vld [vmem:[#allocation8 + $0x8] sm:$0xff]   ;;  %v775_v33 = vld [vmem:[#allocation8] sm:$0xff]  }
  0x45   :  { %v776_v34 = vld [vmem:[#allocation10 + $0x38] sm:$0xff]   ;;  %v777_v35 = vld [vmem:[#allocation10 + $0x30] sm:$0xff]   ;;  %v778_v36 = vld [vmem:[#allocation10 + $0x28] sm:$0xff]  }
  0x46   :  { %v779_v37 = vld [vmem:[#allocation10 + $0x20] sm:$0xff]   ;;  %v780_v38 = vld [vmem:[#allocation10 + $0x18] sm:$0xff]   ;;  %v781_v49 = vld [vmem:[#allocation10 + $0x10] sm:$0xff]  }
  0x47   :  { %664 = vmatpush3.bf16.msra.mxu0 %v753_v3  ;;  %684 = vmatpush3.bf16.msra.mxu1 %v762_v8  ;;  %v596_v39 = vld [vmem:[%s1063_s4] ss:$0 sm:$0xff]  ;;  %v782_v50 = vld [vmem:[#allocation10 + $0x8] sm:$0xff]   ;;  %v783_v51 = vld [vmem:[#allocation10] sm:$0xff]  }
  0x48   :  { %665 = vmatprep.subr.bf16.mxu0 %v919_v0  ;;  %685 = vmatprep.subr.bf16.mxu1 %v919_v0  ;;  %v605_v52 = vld [vmem:[%s1065_s6] ss:$0 sm:$0xff]  ;;  %s884_s6 = scalar_lea.vmem %s573_s17, 256 }
  0x49   :  { %v614_v62 = vld [vmem:[%s1067_s8] ss:$0 sm:$0xff]  ;;  %p885_p11 = scmp.ne.s32.totalorder %s573_s17, %s884_s6  ;;  %p890_p13 = scmp.lt.s32.totalorder %s884_s6, %s884_s6 }
  0x4b   :  { %666 = vmatpush3.bf16.msra.mxu0 %v754_v5  ;;  %686 = vmatpush3.bf16.msra.mxu1 %v763_v10  ;;  %p891_p0 = por %p890_p13, %p889_p12 }
  0x4c   :  { %667 = vmatprep.subr.bf16.mxu0 %v919_v0  ;;  %687 = vmatprep.subr.bf16.mxu1 %v919_v0 }
  0x4d   :  { %p892_p1 = pnand %p891_p0, %p885_p11 }
  0x4f   :  { %668 = vmatpush3.bf16.msra.mxu0 %v755_v7  ;;  %688 = vmatpush3.bf16.msra.mxu1 %v764_v12 }
  0x50   :  { %669 = vmatprep.subr.bf16.mxu0 %v919_v0  ;;  %689 = vmatprep.subr.bf16.mxu1 %v919_v0 }
  0x53   :  { %670 = vmatpush3.bf16.msra.mxu0 %v756_v9  ;;  %690 = vmatpush3.bf16.msra.mxu1 %v765_v14 }
  0x54   :  { %671 = vmatprep.subr.bf16.mxu0 %v919_v0  ;;  %691 = vmatprep.subr.bf16.mxu1 %v919_v0 }
  0x57   :  { %672 = vmatpush3.bf16.msra.mxu0 %v757_v11  ;;  %692 = vmatpush3.bf16.msra.mxu1 %v766_v16 }
  0x58   :  { %673 = vmatprep.subr.bf16.mxu0 %v919_v0  ;;  %693 = vmatprep.subr.bf16.mxu1 %v919_v0 }
  0x5b   :  { %674 = vmatpush3.bf16.msra.mxu0 %v758_v13  ;;  %694 = vmatpush3.bf16.msra.mxu1 %v767_v17 }
  0x5c   :  { %699 = vmatprep.subr.bf16.mxu0 %v919_v0  ;;  %719 = vmatprep.subr.bf16.mxu1 %v919_v0 }
  0x5e   :  { %676 = vmatmul.mubr.bf16.vlgmr.msra.gmra.mxu0 %v759_v15 }
  0x5f   :  { %715 = vmatprep.mubr.msk.bf16.mxu0 %vm920_vm0, %v919_v0  ;;  %700 = vmatpush3.bf16.msra.mxu0 %v768_v18 }
  0x60   :  { %701 = vmatprep.subr.bf16.mxu0 %v919_v0 }
  0x63   :  { %702 = vmatpush3.bf16.msra.mxu0 %v769_v19 }
  0x64   :  { %703 = vmatprep.subr.bf16.mxu0 %v919_v0 }
  0x67   :  { %704 = vmatpush3.bf16.msra.mxu0 %v770_v20 }
  0x68   :  { %705 = vmatprep.subr.bf16.mxu0 %v919_v0 }
  0x6b   :  { %706 = vmatpush3.bf16.msra.mxu0 %v771_v21 }
  0x6c   :  { %707 = vmatprep.subr.bf16.mxu0 %v919_v0 }
  0x6f   :  { %708 = vmatpush3.bf16.msra.mxu0 %v772_v22 }
  0x70   :  { %709 = vmatprep.subr.bf16.mxu0 %v919_v0 }
  0x73   :  { %710 = vmatpush3.bf16.msra.mxu0 %v773_v31 }
  0x74   :  { %711 = vmatprep.subr.bf16.mxu0 %v919_v0 }
  0x77   :  { %712 = vmatpush3.bf16.msra.mxu0 %v774_v32 }
  0x78   :  { %713 = vmatprep.subr.bf16.mxu0 %v919_v0 }
  0x7b   :  { %714 = vmatpush3.bf16.msra.mxu0 %v775_v33 }
 0x11e   :  { %v215_v23 = vpop.f32.mrf.mxu0 }
 0x11f   :  { %v216_v27 = vadd.f32 %v586_v24, %v215_v23 }
 0x120   :  { %v677_v25 = vpop.f32.mrf.mxu0 }
 0x122   :  { %v218_v26 = vpop.f32.mrf.mxu0 }
 0x123   :  { %v219_v28 = vadd.f32 %v586_v24, %v218_v26 }
 0x124   :  { %v678_v29 = vpop.f32.mrf.mxu0 }
 0x125   :  { %v222_v30 = vpack.c.bf16 %v219_v28, %v216_v27 }
 0x127   :  { %696 = vmatmul.mubr.bf16.vlgmr.msra.gmra.mxu1 %v222_v30 }
 0x128   :  { %735 = vmatprep.mubr.msk.bf16.mxu1 %vm920_vm0, %v919_v0  ;;  %720 = vmatpush3.bf16.msra.mxu1 %v776_v34 }
 0x129   :  { %721 = vmatprep.subr.bf16.mxu1 %v919_v0 }
 0x12c   :  { %722 = vmatpush3.bf16.msra.mxu1 %v777_v35 }
 0x12d   :  { %723 = vmatprep.subr.bf16.mxu1 %v919_v0 }
 0x130   :  { %724 = vmatpush3.bf16.msra.mxu1 %v778_v36 }
 0x131   :  { %725 = vmatprep.subr.bf16.mxu1 %v919_v0 }
 0x134   :  { %726 = vmatpush3.bf16.msra.mxu1 %v779_v37 }
 0x135   :  { %727 = vmatprep.subr.bf16.mxu1 %v919_v0 }
 0x138   :  { %728 = vmatpush3.bf16.msra.mxu1 %v780_v38 }
 0x139   :  { %729 = vmatprep.subr.bf16.mxu1 %v919_v0 }
 0x13c   :  { %730 = vmatpush3.bf16.msra.mxu1 %v781_v49 }
 0x13d   :  { %731 = vmatprep.subr.bf16.mxu1 %v919_v0 }
 0x140   :  { %732 = vmatpush3.bf16.msra.mxu1 %v782_v50 }
 0x141   :  { %733 = vmatprep.subr.bf16.mxu1 %v919_v0 }
 0x144   :  { %734 = vmatpush3.bf16.msra.mxu1 %v783_v51 }
 0x1e7   :  { %v328_v40 = vpop.f32.mrf.mxu1 }
 0x1e8   :  { %v329_v42 = vadd.f32 %v596_v39, %v328_v40 }
 0x1e9   :  { %v697_v41 = vpop.f32.mrf.mxu1 }
 0x1ea   :  { %v335_v46 = vmax.f32 %v329_v42, 0.0 }
 0x1eb   :  { %v331_v43 = vpop.f32.mrf.mxu1 }
 0x1ec   :  { %v332_v44 = vadd.f32 %v596_v39, %v331_v43 }
 0x1ed   :  { %v698_v45 = vpop.f32.mrf.mxu1 }
 0x1ee   :  { %v336_v47 = vmax.f32 %v332_v44, 0.0 }
 0x1f0   :  { %v337_v48 = vpack.c.bf16 %v336_v47, %v335_v46 }
 0x1f2   :  { %716 = vmatmul.mubr.bf16.vlgmr.msra.gmra.mxu0 %v337_v48 }
 0x2b2   :  { %v443_v53 = vpop.f32.mrf.mxu0 }
 0x2b3   :  { %v444_v55 = vadd.f32 %v605_v52, %v443_v53 }
 0x2b4   :  { %v717_v54 = vpop.f32.mrf.mxu0 }
 0x2b5   :  { %v450_v59 = vmax.f32 %v444_v55, 0.0 }
 0x2b6   :  { %v446_v56 = vpop.f32.mrf.mxu0 }
 0x2b7   :  { %v447_v57 = vadd.f32 %v605_v52, %v446_v56 }
 0x2b8   :  { %v718_v58 = vpop.f32.mrf.mxu0 }
 0x2b9   :  { %v451_v60 = vmax.f32 %v447_v57, 0.0 }
 0x2bb   :  { %v452_v61 = vpack.c.bf16 %v451_v60, %v450_v59 }
 0x2bd   :  { %736 = vmatmul.mubr.bf16.vlgmr.msra.gmra.mxu1 %v452_v61 }
 0x37d   :  { %v558_v63 = vpop.f32.mrf.mxu1 }
 0x37e   :  { %v559_v0 = vadd.f32 %v614_v62, %v558_v63 }
 0x37f   :  { %v737_v1 = vpop.f32.mrf.mxu1 }
 0x380   :  { %565 = vst [vmem:[#allocation11] sm:$0xff] %v559_v0 }
 0x381   :  { %v561_v2 = vpop.f32.mrf.mxu1 }
 0x382   :  { %v562_v3 = vadd.f32 %v614_v62, %v561_v2 }
 0x383   :  { %v738_v4 = vpop.f32.mrf.mxu1 }
 0x384   :  { %566 = vst [vmem:[#allocation11 + $0x8] sm:$0xff] %v562_v3 }
 0x385   :  { %895 = shalt.err (!%p892_p1)
}
 0x386   :  { %s922_s18 = smov 128   ;;  %s923_s8 = smov 8  }
 0x387   :  { %578 = dma.vmem_to_hbm [thread:$0]  %s573_s17, 256, %s1068_s9, [#allocation4], %s922_s18, %s922_s18, %s923_s8  }
 0x388   :  { %910 = dma.done.wait [#allocation4], 256  }
 0x389   :  { %911 = vsyncadd [#allocation4], 4294967040 }
 0x38a   :  { %582 = vsyncpa [#allocation3], 1 }
 0x38b   :  { %583 = vsyncpa [#allocation6], 1 }
 0x38c   :  { %584 = vsyncpa [#allocation9], 1 }
 0x38d   :  { %585 = vsyncpa [#allocation4], 1 }

</bundles_post_ra>
